<compile_context>
chip_gen: v5e
topology: v5e:2x2
jax: 0.10.0
libtpu: 0.0.40
codegen_flags: <defaults>
</compile_context>

<pallas_src>
import jax
import jax.numpy as jnp
from jax.experimental import pallas as pl
from jax.experimental.pallas import tpu as pltpu


def _focal_loss_kernel(x_ref, t_ref, w_ref, o_ref):
    # x_ref: (C, S, 128) logits tile (native dtype; class on the leading dim,
    #        pixels laid out as S sublane-rows x 128 lanes)
    # t_ref: (S, 128)   int32 target class per pixel
    # w_ref: (C, 1, 1)  float32 per-class weights
    # o_ref: (S, 128)   float32 per-pixel loss
    x = x_ref[...].astype(jnp.float32)                  # (C, S, 128)
    t = t_ref[...]                                      # (S, 128)

    # Numerically-stable softmax statistics over the class axis.  axis=0 is a
    # leading (non-layout) dim -> per-vreg VALU accumulation, no XLU.
    m = jnp.max(x, axis=0)                              # (S, 128)
    z = x - m[None]                                     # (C, S, 128)
    e = jnp.exp(z)                                      # only (C,T)-sized EUP op
    s = jnp.sum(e, axis=0)                              # (S, 128)

    # Gather-first: pull out the target row once, then all focal math is per-pixel.
    cls = jax.lax.broadcasted_iota(jnp.int32, x.shape, 0)
    onehot = cls == t[None]                             # (C, S, 128)
    z_t = jnp.sum(jnp.where(onehot, z, 0.0), axis=0)    # (S, 128)
    w_b = jnp.broadcast_to(w_ref[...], x.shape)         # per-class weight splat
    w_t = jnp.sum(jnp.where(onehot, w_b, 0.0), axis=0)  # (S, 128)
    # Note: out-of-range targets make the one-hot all-false -> loss 0 for that
    # pixel (the original module defines no ignore_index).

    # Per-pixel focal term (exact divide / log; no approx reciprocal needed now
    # that it only feeds (S,128)-sized math).
    p_t = jnp.exp(z_t) / s                              # softmax prob of target class
    logp_t = z_t - jnp.log(s)                           # log_softmax of target class
    one_minus_p = 1.0 - p_t
    o_ref[...] = -(w_t * one_minus_p * one_minus_p * logp_t)


def _plan_tiling(s_total, c, logits_itemsize):
    """Pick rows-per-step (tile_s) and a VMEM limit from this generation's VMEM."""
    try:
        vmem_cap = int(pltpu.get_tpu_info().vmem_capacity_bytes)
    except Exception:  # non-TPU / interpret fallback: assume the smallest (v7x, 64 MiB)
        vmem_cap = 64 << 20

    # Double-buffered bytes per 128-pixel row: logits + int32 target + f32 output.
    # The (C, S, 128) layout has no sublane padding on any of these buffers.
    bytes_per_row = 2 * 128 * (c * logits_itemsize + 4 + 4)
    # Working-set budget: ~40% of physical VMEM (51 MiB on v5e/v6e, 25 MiB on v7x).
    budget = max(16 << 20, min(int(vmem_cap * 0.4), 56 << 20))
    cap_s = max(16, budget // bytes_per_row)

    if s_total <= cap_s:
        tile_s = s_total                          # full spatial extent: always legal
    else:
        tile_s = max(16, (cap_s // 16) * 16)      # 16-row granularity (f32 & bf16 safe)

    working = tile_s * bytes_per_row + 2 * c * 8 * 128 * 4   # + padded weight buffers
    vmem_limit = int(min(vmem_cap - (4 << 20), max(32 << 20, working + (4 << 20))))
    return tile_s, vmem_limit


def focal_loss(logits_nchw, target_nhw, weight):
    """FocalLoss.forward: logits (N,C,H,W), target (N,H,W) -> unreduced loss (N,H,W)."""
    N, C, H, W = logits_nchw.shape
    HW = H * W
    itemsize = jnp.dtype(logits_nchw.dtype).itemsize

    s_total = pl.cdiv(HW, 128)                    # 128-pixel lane rows needed
    tile_s, vmem_limit = _plan_tiling(s_total, C, itemsize)
    num_blocks = pl.cdiv(s_total, tile_s)
    s_pad = num_blocks * tile_s
    hw_pad = s_pad * 128

    # Free reshapes; pad only when HW is not already lane/tile aligned.
    x = logits_nchw.reshape(N, C, HW)
    t = target_nhw.reshape(N, HW).astype(jnp.int32)
    if hw_pad != HW:
        x = jnp.pad(x, ((0, 0), (0, 0), (0, hw_pad - HW)))
        t = jnp.pad(t, ((0, 0), (0, hw_pad - HW)))   # padded targets = class 0 (in range)
    x = x.reshape(N, C, s_pad, 128)
    t = t.reshape(N, s_pad, 128)
    w = jnp.asarray(weight, jnp.float32).reshape(C, 1, 1)

    out = pl.pallas_call(
        _focal_loss_kernel,
        out_shape=jax.ShapeDtypeStruct((N, s_pad, 128), jnp.float32),
        grid_spec=pltpu.PrefetchScalarGridSpec(
            num_scalar_prefetch=0,
            grid=(N, num_blocks),
            in_specs=[
                # logits: (C, tile_s, 128) per step, batch dim squeezed
                pl.BlockSpec((None, C, tile_s, 128), lambda n, j: (n, 0, j, 0)),
                # targets: (tile_s, 128)
                pl.BlockSpec((None, tile_s, 128), lambda n, j: (n, j, 0)),
                # class weights: tiny constant block, invariant across the grid
                pl.BlockSpec((C, 1, 1), lambda n, j: (0, 0, 0)),
            ],
            out_specs=pl.BlockSpec((None, tile_s, 128), lambda n, j: (n, j, 0)),
        ),
        compiler_params=pltpu.CompilerParams(
            dimension_semantics=("parallel", "parallel"),
            vmem_limit_bytes=vmem_limit,
        ),
    )(x, t, w)

    out = out.reshape(N, hw_pad)
    if hw_pad != HW:
        out = out[:, :HW]
    return out.reshape(N, H, W)


def _reference(logits_nchw, target_nhw, weight):
    # Pure-JAX reference of the PyTorch forward (NCHW, reduce=False).
    lf = logits_nchw.astype(jnp.float32)
    p = jax.nn.softmax(lf, axis=1)
    logp = jax.nn.log_softmax(lf, axis=1)
    focal = (1.0 - p) ** 2 * logp                      # (N, C, H, W)
    picked = jnp.take_along_axis(focal, target_nhw[:, None, :, :], axis=1)[:, 0]
    wt = jnp.asarray(weight, jnp.float32)[target_nhw]
    return -wt * picked                                # (N, H, W)


if __name__ == "__main__":
    key = jax.random.PRNGKey(0)
    k1, k2 = jax.random.split(key)

    N, C, H, W = 2, 4, 16, 16
    logits = jax.random.normal(k1, (N, C, H, W), jnp.float32)
    target = jax.random.randint(k2, (N, H, W), 0, C, dtype=jnp.int32)
    # deterministic per-class weights (stand-in for the numpy `weight` array)
    weight = jnp.arange(1, C + 1, dtype=jnp.float32) / C

    loss = focal_loss(logits, target, weight)
    loss = jax.block_until_ready(loss)

    ref = _reference(logits, target, weight)
    assert loss.shape == (N, H, W)
    # Exact divide/log in the per-pixel path -> tight f32 tolerance.
    assert jnp.allclose(loss, ref, rtol=1e-4, atol=1e-5), float(
        jnp.max(jnp.abs(loss - ref)))

    print("KERNEL_OK")
</pallas_src>

<mosaic_0001>
module attributes {stable_mosaic.version = 11 : i64} {
  func.func @_focal_loss_kernel(%arg0: i32, %arg1: i32, %arg2: memref<1x4x2x128xf32, #tpu.memory_space<vmem>>, %arg3: memref<1x2x128xi32, #tpu.memory_space<vmem>>, %arg4: memref<4x1x1xf32, #tpu.memory_space<vmem>>, %arg5: memref<1x2x128xf32, #tpu.memory_space<vmem>>) attributes {dimension_semantics = [#tpu.dimension_semantics<parallel>, #tpu.dimension_semantics<parallel>], iteration_bounds = array<i64: 2, 1>, scalar_prefetch = 0 : i64, scratch_operands = 0 : i64, tpu.core_type = #tpu.core_type<tc>, window_params = [{transform_indices = @transform_0, window_bounds = array<i64: 1, 4, 2, 128>}, {transform_indices = @transform_1, window_bounds = array<i64: 1, 2, 128>}, {pipeline_mode = #tpu.pipeline_mode<synchronous>, transform_indices = @transform_2, window_bounds = array<i64: 4, 1, 1>}, {transform_indices = @transform_3, window_bounds = array<i64: 1, 2, 128>}]} {
    %c0 = arith.constant 0 : index
    %c0_0 = arith.constant 0 : index
    %c0_1 = arith.constant 0 : index
    %c0_2 = arith.constant 0 : index
    %0 = vector.load %arg2[%c0, %c0_0, %c0_1, %c0_2] : memref<1x4x2x128xf32, #tpu.memory_space<vmem>>, vector<1x4x2x128xf32>
    %1 = vector.shape_cast %0 : vector<1x4x2x128xf32> to vector<4x2x128xf32>
    %c0_3 = arith.constant 0 : index
    %c0_4 = arith.constant 0 : index
    %c0_5 = arith.constant 0 : index
    %2 = vector.load %arg3[%c0_3, %c0_4, %c0_5] : memref<1x2x128xi32, #tpu.memory_space<vmem>>, vector<1x2x128xi32>
    %3 = vector.shape_cast %2 : vector<1x2x128xi32> to vector<2x128xi32>
    %cst = arith.constant dense<0xFF800000> : vector<2x128xf32>
    %4 = vector.multi_reduction <maximumf>, %1, %cst [0] : vector<4x2x128xf32> to vector<2x128xf32>
    %5 = vector.shape_cast %4 : vector<2x128xf32> to vector<1x2x128xf32>
    %6 = vector.broadcast %5 : vector<1x2x128xf32> to vector<4x2x128xf32>
    %7 = arith.subf %1, %6 : vector<4x2x128xf32>
    %8 = math.exp %7 : vector<4x2x128xf32>
    %cst_6 = arith.constant dense<0.000000e+00> : vector<2x128xf32>
    %9 = vector.multi_reduction <add>, %8, %cst_6 [0] : vector<4x2x128xf32> to vector<2x128xf32>
    %10 = tpu.iota {dimensions = array<i32: 0>} : vector<4x2x128xi32>
    %11 = vector.shape_cast %3 : vector<2x128xi32> to vector<1x2x128xi32>
    %12 = vector.broadcast %11 : vector<1x2x128xi32> to vector<4x2x128xi32>
    %13 = arith.cmpi eq, %10, %12 : vector<4x2x128xi32>
    %cst_7 = arith.constant 0.000000e+00 : f32
    %14 = vector.broadcast %cst_7 : f32 to vector<4x2x128xf32>
    %15 = arith.select %13, %7, %14 : vector<4x2x128xi1>, vector<4x2x128xf32>
    %cst_8 = arith.constant dense<0.000000e+00> : vector<2x128xf32>
    %16 = vector.multi_reduction <add>, %15, %cst_8 [0] : vector<4x2x128xf32> to vector<2x128xf32>
    %c0_9 = arith.constant 0 : index
    %c0_10 = arith.constant 0 : index
    %c0_11 = arith.constant 0 : index
    %17 = vector.load %arg4[%c0_9, %c0_10, %c0_11] : memref<4x1x1xf32, #tpu.memory_space<vmem>>, vector<4x1x1xf32>
    %18 = vector.shape_cast %17 : vector<4x1x1xf32> to vector<4x1x1xf32>
    %19 = vector.broadcast %18 : vector<4x1x1xf32> to vector<4x2x128xf32>
    %cst_12 = arith.constant 0.000000e+00 : f32
    %20 = vector.broadcast %cst_12 : f32 to vector<4x2x128xf32>
    %21 = arith.select %13, %19, %20 : vector<4x2x128xi1>, vector<4x2x128xf32>
    %cst_13 = arith.constant dense<0.000000e+00> : vector<2x128xf32>
    %22 = vector.multi_reduction <add>, %21, %cst_13 [0] : vector<4x2x128xf32> to vector<2x128xf32>
    %23 = math.exp %16 : vector<2x128xf32>
    %24 = arith.divf %23, %9 : vector<2x128xf32>
    %25 = math.log %9 : vector<2x128xf32>
    %26 = arith.subf %16, %25 : vector<2x128xf32>
    %cst_14 = arith.constant 1.000000e+00 : f32
    %27 = vector.broadcast %cst_14 : f32 to vector<2x128xf32>
    %28 = arith.subf %27, %24 : vector<2x128xf32>
    %29 = arith.mulf %22, %28 : vector<2x128xf32>
    %30 = arith.mulf %29, %28 : vector<2x128xf32>
    %31 = arith.mulf %30, %26 : vector<2x128xf32>
    %cst_15 = arith.constant 0.000000e+00 : f32
    %32 = vector.broadcast %cst_15 : f32 to vector<2x128xf32>
    %33 = arith.subf %32, %31 : vector<2x128xf32>
    %c0_16 = arith.constant 0 : index
    %c0_17 = arith.constant 0 : index
    %c0_18 = arith.constant 0 : index
    %34 = vector.load %arg5[%c0_16, %c0_17, %c0_18] : memref<1x2x128xf32, #tpu.memory_space<vmem>>, vector<1x2x128xf32>
    %35 = vector.shape_cast %34 : vector<1x2x128xf32> to vector<2x128xf32>
    %36 = vector.shape_cast %33 : vector<2x128xf32> to vector<1x2x128xf32>
    tpu.vector_store %arg5[%c0_16, %c0_17, %c0_18], %36 {strides = array<i32>} : memref<1x2x128xf32, #tpu.memory_space<vmem>>, vector<1x2x128xf32>,
    return
  }
  func.func @transform_0(%arg0: i32, %arg1: i32) -> (i32, i32, i32, i32) {
    %c0_i32 = arith.constant 0 : i32
    %c0_i32_0 = arith.constant 0 : i32
    %c0_i32_1 = arith.constant 0 : i32
    return %arg0, %c0_i32, %arg1, %c0_i32_0 : i32, i32, i32, i32
  }
  func.func @transform_1(%arg0: i32, %arg1: i32) -> (i32, i32, i32) {
    %c0_i32 = arith.constant 0 : i32
    %c0_i32_0 = arith.constant 0 : i32
    return %arg0, %arg1, %c0_i32 : i32, i32, i32
  }
  func.func @transform_2(%arg0: i32, %arg1: i32) -> (i32, i32, i32) {
    %c0_i32 = arith.constant 0 : i32
    %c0_i32_0 = arith.constant 0 : i32
    %c0_i32_1 = arith.constant 0 : i32
    %c0_i32_2 = arith.constant 0 : i32
    return %c0_i32, %c0_i32_0, %c0_i32_1 : i32, i32, i32
  }
  func.func @transform_3(%arg0: i32, %arg1: i32) -> (i32, i32, i32) {
    %c0_i32 = arith.constant 0 : i32
    %c0_i32_0 = arith.constant 0 : i32
    return %arg0, %arg1, %c0_i32 : i32, i32, i32
  }
}

</mosaic_0001>

<bundles_post_ra>
// kernel: tpu_custom_call.1
= control target key start
LH: loop header
LB: loop body
LE: loop exit
PB: predicated region body
PF: predicated region fallthrough
CT: control target
= control target key end

     0   :  { %8 = vsyncpa [#allocation3], 0  ;;  %s861_s0 = inlined_call_operand.hbm [shape: f32[2,4,2,128], index: 0, kind: input, shape index: {}]   ;;  %s862_s1 = inlined_call_operand.vmem [shape: s32[2,2,128], index: 1, kind: input, shape index: {}]   ;;  %s863_s2 = inlined_call_operand.vmem [shape: f32[4,1,1], index: 2, kind: input, shape index: {}]   ;;  %s864_s3 = inlined_call_operand.hbm [shape: f32[2,2,128], index: 3, kind: output, shape index: {}]  }
   0x1   :  { %10 = vsyncpa [#allocation3 + $0x1], 0 }
   0x2   :  { %11 = vsyncpa [#allocation4], 0 }
   0x3   :  { %13 = vsyncpa [#allocation4 + $0x1], 0  ;;  %s699_s12 = smov 0   ;;  %s701_s13 = smov 0  }
   0x4   :  { %s703_s14 = smov 0   ;;  %s705_s15 = smov 0  }
   0x5   :  { %s707_s16 = smov 0   ;;  %s709_s17 = smov 0  }
   0x6 LB: > { %s461_s18 = sadd.s32 4294967295, %s674_s17   ;;  %s462_s19 = sadd.s32 4294967294, %s674_s17   ;;  %s674_s17 = sphi %s709_s17, %s19_s17   ;;  %s670_s16 = sphi %s707_s16, %s873_s16   ;;  %s666_s15 = sphi %s705_s15, %s872_s15   ;;  %s662_s14 = sphi %s703_s14, %s871_s14   ;;  %s658_s13 = sphi %s701_s13, %s870_s13   ;;  %s654_s12 = sphi %s699_s12, %s869_s12  }
   0x7   : > { %s31_s20 = sadd.s32 1, %s670_s16  ;;  %s40_s21 = sadd.s32 1, %s662_s14 }
   0x8   : > { %p33_p0 = scmp.ge.s32.totalorder %s31_s20, 2  ;;  %p47_p1 = scmp.ne.s32.totalorder %s662_s14, %s658_s13 }
   0x9   : > { %p48_p2 = scmp.eq.s32.totalorder %s674_s17, 0  ;;  %p53_p3 = scmp.ne.s32.totalorder %s658_s13, %s654_s12 }
   0xa   : > { %s875_s20 = smov (%p33_p0, %s31_s20), 0  ;;  %p54_p5 = scmp.eq.s32.totalorder %s461_s18, 0 }
   0xb   : > { %p740_p4 = por %p48_p2, %p47_p1  ;;  %s35_s23 = ssub.s32 %s670_s16, %s875_s20 }
   0xc   : > { %p128_p6 = scmp.eq.s32.totalorder %s461_s18, 1  ;;  %p38_p7 = scmp.eq.s32.totalorder %s35_s23, 0 }
   0xd   : > { %p746_p8 = por %p54_p5, %p53_p3  ;;  %p134_p10 = scmp.eq.s32.totalorder %s462_s19, 1 }
   0xe   : > { %p750_p9 = por %p128_p6, %p47_p1  ;;  %p464_p12 = scmp.ge.s32.totalorder %s674_s17, 2 }
   0xf   : > { %s755_s26 = scalar_select %p38_p7, %s662_s14, %s40_s21  }
  0x10   : > { %p757_p11 = por %p134_p10, %p53_p3  ;;  %p489_p13 = scmp.lt.s32.totalorder %s674_s17, 2 }
  0x11   : > { %s157_s28 = sand.u32 1, %s662_s14   ;;  %s476_s30 = sshll.u32 %s670_s16, 3 }
  0x12   : > { %s465_s29 = sshll.u32 %s157_s28, 3  ;;  %s167_s6 = scalar_lea.hbm %s861_s0, %s476_s30 }
  0x13   : > { %s161_s7 = scalar_lea.vmem [#allocation2], %s465_s29  ;;  %s168_s9 = sshll.u32 %s167_s6, 4  ;;  %s169_s9 = int_to_ptr.hbm [resolvable:$true] %s168_s9 }
  0x14   : > { %s170_s8 = sshll.u32 %s161_s7, 4  ;;  %p482_p0 = pnand %p489_p13, %p740_p4  ;;  %s171_s8 = int_to_ptr.vmem [resolvable:$true] %s170_s8 }
  0x15   : > { %p468_p1 = scmp.ge.s32.totalorder %s674_s17, 1  ;;  %s158_s10 = scalar_lea.sflag [#allocation3], %s157_s28 }
  0x16   : > { %s676_s11 = smov 32   ;;  %s677_s18 = smov 2  }
  0x17   : > { %484 = dma.hbm_to_vmem [thread:$0]  (!%p482_p0), %s169_s9, 128, %s171_s8, %s158_s10, %s676_s11, %s676_s11, %s677_s18  }
  0x18   : > { %p188_p2 = scmp.lt.s32.totalorder %s674_s17, 3 }
  0x1a   : > { %p189_p3 = pnand %p468_p1, %p188_p2 }
  0x1b   : > { %s773_s19 = sand.u32 (!%p189_p3), 1, %s658_s13  }
  0x1c   : > { %192 = sbr.rel (%p189_p3) target bundleno = 178 (0xb2), region = 32  ;;  %s469_s21 = sshll.u32 (!%p189_p3), %s773_s19, 3 }
  0x1d   : > { %s195_s23 = scalar_lea.sflag (!%p189_p3), [#allocation3], %s773_s19  ;;  %s198_s29 = scalar_lea.vmem (!%p189_p3), [#allocation2], %s469_s21 }
  0x21   : > { %645 = dma.done.wait (%p746_p8), %s195_s23, 128  }
  0x22   : > { %647 = vsyncadd (%p746_p8), %s195_s23, 4294967168  ;;  %v678_v0 = vmov 0   ;;  %v544_v1 = vld [vmem:[%s863_s2 + $0x2] ss:$0 sm:$0xff]  ;;  %v545_v2 = vld [vmem:[%s863_s2] ss:$0 sm:$0xff] }
  0x23   : > { %543 = vset.pattern.permute.xlu1 %v678_v0  ;;  %542 = vset.pattern.permute.xlu0 %v678_v0  ;;  %v546_v3 = vld [vmem:[%s863_s2 + $0x3] ss:$0 sm:$0xff]  ;;  %v547_v4 = vld [vmem:[%s863_s2 + $0x1] ss:$0 sm:$0xff]  ;;  %vm241_vm0 = vcmask 1041408   ;;  %p229_p4 = scmp.lt.s32.totalorder %s666_s15, 1 }
  0x24   : > { %304 = vperm.xlu1 %543, %v544_v1   ;;  %296 = vperm.xlu0 %542, %v545_v2   ;;  %v236_v5 = vld [vmem:[%s198_s29] sm:$0x3]  ;;  %v237_v6 = vld [vmem:[%s198_s29 + $0x2] sm:$0x3]  ;;  %v238_v7 = vld [vmem:[%s198_s29 + $0x4] sm:$0x3] }
  0x25   : > { %v239_v8 = vld [vmem:[%s198_s29 + $0x6] sm:$0x3]  ;;  %v242_v9 = vsel %vm241_vm0, %v236_v5, -inf  ;;  %v243_v10 = vsel %vm241_vm0, %v237_v6, -inf  ;;  %v244_v11 = vsel %vm241_vm0, %v238_v7, -inf  ;;  %s230_s8 = scalar_select %p229_p4, %s666_s15, 1 }
  0x26   : > { %v245_v12 = vsel %vm241_vm0, %v239_v8, -inf  ;;  %v246_v13 = vmax.f32 %v242_v9, %v243_v10  ;;  %s470_s21 = sshll.u32 %s773_s19, 1  ;;  %s473_s23 = sshll.u32 %s666_s15, 1 }
  0x27   : > { %v247_v14 = vmax.f32 %v244_v11, %v245_v12  ;;  %s471_s9 = sshll.u32 %s230_s8, 1  ;;  %s360_s28 = scalar_lea.hbm %s864_s3, %s473_s23 }
  0x28   : > { %s235_s18 = scalar_lea.vmem %s862_s1, %s471_s9  ;;  %s228_s30 = scalar_lea.vmem [#allocation5], %s470_s21 }
  0x29   : > { %v248_v15 = vmax.f32 %v246_v13, %v247_v14  ;;  %v240_v34 = vld [vmem:[%s235_s18] sm:$0x3]  ;;  %s362_s4 = sshll.u32 %s228_s30, 4  ;;  %s364_s5 = sshll.u32 %s360_s28, 4  ;;  %s363_s4 = int_to_ptr.vmem [resolvable:$true] %s362_s4  ;;  %s365_s5 = int_to_ptr.hbm [resolvable:$true] %s364_s5 }
  0x2a   : > { %vm268_vm1 = vcmp.eq.s32.totalorder %v240_v34, 0  ;;  %vm269_vm2 = vcmp.eq.s32.totalorder %v240_v34, 1  ;;  %vm270_vm3 = vcmp.eq.s32.totalorder %v240_v34, 2  ;;  %vm271_vm4 = vcmp.eq.s32.totalorder %v240_v34, 3  ;;  %s349_s6 = scalar_lea.sflag [#allocation4], %s773_s19  ;;  %s606_s7 = sshra.s32 %s365_s5, 4  ;;  %s607_s7 = int_to_ptr.hbm [resolvable:$true] %s606_s7 }
  0x2b   : > { %v249_v16 = vsub.f32 %v236_v5, %v248_v15  ;;  %v250_v17 = vsub.f32 %v237_v6, %v248_v15  ;;  %v251_v19 = vsub.f32 %v238_v7, %v248_v15  ;;  %v252_v22 = vsub.f32 %v239_v8, %v248_v15  ;;  %s608_s15 = scalar_lea.hbm %s607_s7, 2  ;;  %s612_s9 = scalar_lea.hbm %s864_s3, 4 }
  0x2c   : > { %308 = vperm.xlu1 %543, %v546_v3   ;;  %300 = vperm.xlu0 %542, %v547_v4   ;;  %p609_p5 = scmp.ne.s32.totalorder %s607_s7, %s608_s15  ;;  %p613_p8 = scmp.lt.s32.totalorder %s607_s7, %s864_s3 }
  0x2d   : > { %v253_v18 = vmul.f32 1.442695, %v249_v16  ;;  %v255_v20 = vmul.f32 1.442695, %v250_v17  ;;  %v257_v21 = vmul.f32 1.442695, %v251_v19  ;;  %p614_p10 = scmp.lt.s32.totalorder %s612_s9, %s608_s15 }
  0x2e   : > { %v259_v23 = vmul.f32 1.442695, %v252_v22  ;;  %v272_v36 = vsel %vm268_vm1, %v249_v16, 0.0  ;;  %v273_v37 = vsel %vm269_vm2, %v250_v17, 0.0  ;;  %v274_v40 = vsel %vm270_vm3, %v251_v19, 0.0  ;;  %p610_p6 = pnand %p609_p5, %p750_p9 }
  0x2f   : > { %548 = vpow2.f32 %v253_v18  ;;  %v276_v38 = vsel %vm241_vm0, %v272_v36, 0.0  ;;  %v277_v39 = vsel %vm241_vm0, %v273_v37, 0.0  ;;  %v279_v43 = vsel %vm241_vm0, %v274_v40, 0.0  ;;  %p615_p13 = por %p614_p10, %p613_p8 }
  0x30   : > { %550 = vpow2.f32 %v255_v20  ;;  %v278_v42 = vadd.f32 %v277_v39, %v276_v38  ;;  %v275_v44 = vsel %vm271_vm4, %v252_v22, 0.0  ;;  %p611_p7 = pneg %p610_p6 }
  0x31   : > { %552 = vpow2.f32 %v257_v21  ;;  %v281_v47 = vsel %vm241_vm0, %v275_v44, 0.0 }
  0x32   : > { %554 = vpow2.f32 %v259_v23  ;;  %v280_v46 = vadd.f32 %v279_v43, %v278_v42  ;;  %p616_p0 = pnand %p615_p13, %p611_p7 }
  0x34   : > { %v282_v49 = vadd.f32 %v281_v47, %v280_v46 }
  0x35   : > { %v549_v24 = vpop.eup %548 }
  0x36   : > { %v551_v25 = vpop.eup %550  ;;  %v261_v26 = vsel %vm241_vm0, %v549_v24, 0.0  ;;  %v322_v51 = vmul.f32 1.442695, %v282_v49 }
  0x37   : > { %v262_v27 = vsel %vm241_vm0, %v551_v25, 0.0  ;;  %v553_v28 = vpop.eup %552 }
  0x38   : > { %v263_v29 = vadd.f32 %v262_v27, %v261_v26  ;;  %v264_v30 = vsel %vm241_vm0, %v553_v28, 0.0  ;;  %v555_v31 = vpop.eup %554 }
  0x39   : > { %v266_v33 = vsel %vm241_vm0, %v555_v31, 0.0 }
  0x3a   : > { %v265_v32 = vadd.f32 %v264_v30, %v263_v29 }
  0x3c   : > { %v267_v35 = vadd.f32 %v266_v33, %v265_v32 }
  0x3e   : > { %556 = vrcp.f32 %v267_v35  ;;  %vm329_vm5 = vweird.f32 %v267_v35  ;;  %v335_v52 = vand.u32 2147483648, %v267_v35  ;;  %v333_v55 = vand.u32 2147483647, %v267_v35 }
  0x3f   : > { %558 = vpow2.f32 %v322_v51 }
  0x40   : > { %v336_v57 = vor.u32 1.1754944e-38, %v335_v52  ;;  %vm334_vm8 = vcmp.eq.f32.partialorder %v333_v55, 8.507059e+37  ;;  %560 = vlog2.f32 %v267_v35 }
  0x44   : > { %v557_v41 = vpop.eup %556 }
  0x45   : > { %v325_v45 = vmul.f32 %v557_v41, %v267_v35  ;;  %vm330_vm6 = vweird.f32 %v557_v41  ;;  %v559_v59 = vpop.eup %558 }
  0x46   : > { %vm331_vm7 = vmor %vm329_vm5, %vm330_vm6  ;;  %v561_v3 = vpop.eup %560 }
  0x47   : > { %v326_v48 = vsub.f32 1.0, %v325_v45  ;;  %v340_v10 = vmul.f32 0.6931472, %v561_v3 }
  0x49   : > { %v327_v50 = vmul.f32 %v557_v41, %v326_v48  ;;  %v341_v14 = vsub.f32 %v282_v49, %v340_v10 }
  0x4b   : > { %v328_v54 = vadd.f32 %v557_v41, %v327_v50 }
  0x4d   : > { %v332_v58 = vsel %vm331_vm7, %v557_v41, %v328_v54 }
  0x4e   : > { %v337_v60 = vsel %vm334_vm8, %v336_v57, %v332_v58 }
  0x4f   : > { %v338_v2 = vmul.f32 %v559_v59, %v337_v60 }
  0x51   : > { %v342_v11 = vsub.f32 1.0, %v338_v2 }
  0x96   : > { %v305_v53 = vpop.permute.xlu1 %304  ;;  %v297_v56 = vpop.permute.xlu0 %296 }
  0x97   : > { %v311_v61 = vsel %vm268_vm1, %v297_v56, 0.0  ;;  %v313_v0 = vsel %vm270_vm3, %v305_v53, 0.0 }
  0x98   : > { %v315_v4 = vsel %vm241_vm0, %v311_v61, 0.0  ;;  %v318_v8 = vsel %vm241_vm0, %v313_v0, 0.0 }
  0x9e   : > { %v309_v62 = vpop.permute.xlu1 %308  ;;  %v301_v63 = vpop.permute.xlu0 %300 }
  0x9f   : > { %v312_v1 = vsel %vm269_vm2, %v301_v63, 0.0  ;;  %v314_v6 = vsel %vm271_vm4, %v309_v62, 0.0 }
  0xa0   : > { %v316_v5 = vsel %vm241_vm0, %v312_v1, 0.0  ;;  %v320_v12 = vsel %vm241_vm0, %v314_v6, 0.0 }
  0xa1   : > { %v317_v7 = vadd.f32 %v316_v5, %v315_v4 }
  0xa3   : > { %v319_v9 = vadd.f32 %v318_v8, %v317_v7 }
  0xa5   : > { %v321_v13 = vadd.f32 %v320_v12, %v319_v9 }
  0xa7   : > { %v343_v15 = vmul.f32 %v342_v11, %v321_v13 }
  0xa9   : > { %v344_v16 = vmul.f32 %v343_v15, %v342_v11 }
  0xab   : > { %v345_v17 = vmul.f32 %v344_v16, %v341_v14 }
  0xad   : > { %v346_v18 = vsub.f32 0.0, %v345_v17 }
  0xaf   : > { %347 = vst [vmem:[%s228_s30] sm:$0x3] %v346_v18 }
  0xb0   : > { %619 = shalt.err (!%p616_p0)
}
  0xb1   : > { %479 = dma.vmem_to_hbm [thread:$0]  (%p750_p9), %s363_s4, 32, %s365_s5, %s349_s6  }
  0xb2 PF: > { %s376_s19 = sand.u32 1, %s654_s12   ;;  %p486_p1 = pnand %p464_p12, %p757_p11 }
  0xb3   : > { %s377_s18 = scalar_lea.sflag [#allocation4], %s376_s19 }
  0xb4   : > { %p487_p2 = pneg %p486_p1 }
  0xb6   : > { %649 = dma.done.wait (%p487_p2), %s377_s18, 32  }
  0xb7   : > { %651 = vsyncadd (%p487_p2), %s377_s18, 4294967264  ;;  %s19_s17 = sadd.s32 1, %s674_s17   ;;  %s869_s12 = smov %s658_s13 }
  0xb8   : > { %p16_p3 = scmp.ge.s32.totalorder %s19_s17, 4   ;;  %s870_s13 = smov %s662_s14 }
  0xb9   : > { %s871_s14 = smov %s755_s26  ;;  %s872_s15 = smov %s670_s16 }
  0xba   : > { %s873_s16 = smov %s875_s20  ;;  %18 = sbr.rel (!%p16_p3) target bundleno = 6 (0x6), region = 80 }
  0xbf   :  { %383 = vsyncpa [#allocation3], 1 }
  0xc0   :  { %385 = vsyncpa [#allocation3 + $0x1], 1 }
  0xc1   :  { %386 = vsyncpa [#allocation4], 1 }
  0xc2   :  { %388 = vsyncpa [#allocation4 + $0x1], 1 }

</bundles_post_ra>
